<compile_context>
chip_gen: v5e
topology: v5e:2x2
jax: 0.10.0
libtpu: 0.0.40
codegen_flags: <defaults>
</compile_context>

<pallas_src>
import functools
import math

import jax
import jax.numpy as jnp
from jax.experimental import pallas as pl
from jax.experimental.pallas import tpu as pltpu


# --------------------------------------------------------------------------
# Kernels
# --------------------------------------------------------------------------
def _layernorm_kernel(x_ref, g_ref, b_ref, o_ref, *, features, eps):
    """General path: one LayerNorm row per block row; features on lanes."""
    x = x_ref[...].astype(jnp.float32)
    # One-pass statistics (single traversal of the tile).
    s1 = jnp.sum(x, axis=-1, keepdims=True)
    s2 = jnp.sum(x * x, axis=-1, keepdims=True)
    mean = s1 * jnp.float32(1.0 / features)
    denom = jnp.float32(1.0 / max(features - 1, 1))      # unbiased, like torch.std
    var = (s2 - jnp.float32(features) * mean * mean) * denom
    var = jnp.maximum(var, 0.0)                          # guard tiny negative (cancellation)
    d = jnp.sqrt(var) + jnp.float32(eps)
    # Per-row reciprocal on the EUP (separate VLIW slot) + one Newton step.
    inv = pl.reciprocal(d, approx=True)
    inv = inv * (jnp.float32(2.0) - d * inv)
    # Fold (x - mean) directly into the normalize; gamma/beta are resident f32.
    o_ref[...] = (g_ref[...] * ((x - mean) * inv) + b_ref[...]).astype(o_ref.dtype)


def _layernorm_packed_kernel(x_ref, g_ref, b_ref, ssum_ref, sbcast_ref, o_ref,
                             *, features, eps):
    """Lane-dense path: k = width/features LayerNorm rows packed per block row.

    Per-row sums are segmented reductions ([T, width] @ [width, k]) and the
    per-row scalars are broadcast back with [T, k] @ [k, width]; both are tiny
    MXU matmuls, keeping the VPU work and the store path fully lane-dense.
    """
    x = x_ref[...].astype(jnp.float32)
    ssum = ssum_ref[...]                                          # (width, k)
    s1 = jnp.dot(x, ssum, preferred_element_type=jnp.float32)     # (T, k)
    s2 = jnp.dot(x * x, ssum, preferred_element_type=jnp.float32)
    mean = s1 * jnp.float32(1.0 / features)
    denom = jnp.float32(1.0 / max(features - 1, 1))
    var = jnp.maximum((s2 - jnp.float32(features) * mean * mean) * denom, 0.0)
    d = jnp.sqrt(var) + jnp.float32(eps)
    inv = pl.reciprocal(d, approx=True)
    inv = inv * (jnp.float32(2.0) - d * inv)
    sbcast = sbcast_ref[...]                                      # (k, width)
    mean_b = jnp.dot(mean, sbcast, preferred_element_type=jnp.float32)
    inv_b = jnp.dot(inv, sbcast, preferred_element_type=jnp.float32)
    o_ref[...] = (g_ref[...] * ((x - mean_b) * inv_b) + b_ref[...]).astype(o_ref.dtype)


# --------------------------------------------------------------------------
# Tiling / compiler-parameter helpers
# --------------------------------------------------------------------------
def _vmem_capacity_bytes():
    try:
        cap = int(pltpu.get_tpu_info().vmem_capacity_bytes)
        if cap > 0:
            return cap
    except Exception:
        pass
    return 64 * 1024 * 1024   # conservative (v7x-sized) fallback


def _pick_tile_rows(rows, width, dtype, vmem_capacity):
    """Rows per grid block: large enough to amortize the ~0.35us/step overhead,
    small enough that the double-buffered working set fits scoped VMEM on every
    generation, and split so the parallel grid feeds both v7x TensorCores."""
    itemsize = jnp.dtype(dtype).itemsize
    packing = 8 * max(1, 4 // itemsize)                  # sublane rows per vreg
    # Per block row: double-buffered in + out tiles (input dtype) + ~2 f32 temps.
    bytes_per_row = width * (4 * itemsize + 2 * 4)
    budget = min(3 * vmem_capacity // 8, 40 * 1024 * 1024)   # ~24 MiB v7x, 40 MiB v5e/v6e
    tile = budget // max(bytes_per_row, 1)
    # Keep any single input block <= ~8 MiB so individual DMAs stay pipeline-friendly.
    tile = min(tile, (8 * 1024 * 1024) // max(width * itemsize, 1))
    rows_rounded = -(-rows // packing) * packing
    tile = min(tile, rows_rounded)
    if tile >= rows:
        if rows > packing:
            # Ensure >= 2 grid blocks so dimension_semantics=("parallel",)
            # can actually shard across v7x's two TensorCores.
            tile = -(-rows // (2 * packing)) * packing
        else:
            tile = rows              # single full block (full-dim exemption)
    else:
        tile = max((tile // packing) * packing, packing)
    return int(tile)


def _compiler_params(vmem_capacity):
    return pltpu.CompilerParams(
        dimension_semantics=("parallel",),
        # ~48 MiB on 64-MiB-VMEM v7x, 64 MiB on 128-MiB v5e/v6e (v5e's scoped
        # default of 16 MiB would otherwise be too small for the big tiles).
        vmem_limit_bytes=int(min(3 * vmem_capacity // 4, 64 * 1024 * 1024)),
    )


def _cost_estimate(rows, features, dtype):
    itemsize = jnp.dtype(dtype).itemsize
    return pl.CostEstimate(
        flops=10 * rows * features,
        transcendentals=2 * rows,
        bytes_accessed=2 * rows * features * itemsize,
    )


# --------------------------------------------------------------------------
# Wrappers
# --------------------------------------------------------------------------
def _layer_norm_general(x, gamma, beta, eps, rows, features, vmem_capacity, tile_rows):
    orig_shape = x.shape
    x2 = x.reshape(rows, features)
    gamma2 = gamma.astype(jnp.float32).reshape(1, features)   # cast once, resident
    beta2 = beta.astype(jnp.float32).reshape(1, features)
    if tile_rows is None:
        tile_rows = _pick_tile_rows(rows, features, x.dtype, vmem_capacity)
    grid = (pl.cdiv(rows, tile_rows),)                        # partial block masked
    kernel = functools.partial(_layernorm_kernel, features=features, eps=eps)
    out = pl.pallas_call(
        kernel,
        out_shape=jax.ShapeDtypeStruct((rows, features), x.dtype),
        grid_spec=pltpu.PrefetchScalarGridSpec(
            num_scalar_prefetch=0,
            grid=grid,
            in_specs=[
                pl.BlockSpec((tile_rows, features), lambda i: (i, 0)),
                pl.BlockSpec((1, features), lambda i: (0, 0)),
                pl.BlockSpec((1, features), lambda i: (0, 0)),
            ],
            out_specs=pl.BlockSpec((tile_rows, features), lambda i: (i, 0)),
        ),
        compiler_params=_compiler_params(vmem_capacity),
        cost_estimate=_cost_estimate(rows, features, x.dtype),
    )(x2, gamma2, beta2)
    return out.reshape(orig_shape)


def _layer_norm_packed(x, gamma, beta, eps, k, rows, features, vmem_capacity, tile_rows):
    orig_shape = x.shape
    width = k * features                                      # exactly 128 lanes
    rows2 = rows // k
    x2 = x.reshape(rows2, width)                              # contiguous: free reshape
    g32 = gamma.astype(jnp.float32).reshape(1, features)
    b32 = beta.astype(jnp.float32).reshape(1, features)
    gamma_w = jnp.tile(g32, (1, k))                           # (1, width)
    beta_w = jnp.tile(b32, (1, k))
    # One-hot segment matrices (built once per call, resident across the grid):
    # seg_sum[l, j] = 1 iff lane l belongs to packed row j; seg_bcast = seg_sum.T
    seg_of_lane = jax.lax.broadcasted_iota(jnp.int32, (width, k), 0) // features
    seg_id = jax.lax.broadcasted_iota(jnp.int32, (width, k), 1)
    seg_sum = (seg_of_lane == seg_id).astype(jnp.float32)     # (width, k)
    seg_bcast = seg_sum.T                                     # (k, width)

    if tile_rows is None:
        tile_rows = _pick_tile_rows(rows2, width, x.dtype, vmem_capacity)
    grid = (pl.cdiv(rows2, tile_rows),)
    kernel = functools.partial(_layernorm_packed_kernel, features=features, eps=eps)
    out = pl.pallas_call(
        kernel,
        out_shape=jax.ShapeDtypeStruct((rows2, width), x.dtype),
        grid_spec=pltpu.PrefetchScalarGridSpec(
            num_scalar_prefetch=0,
            grid=grid,
            in_specs=[
                pl.BlockSpec((tile_rows, width), lambda i: (i, 0)),
                pl.BlockSpec((1, width), lambda i: (0, 0)),
                pl.BlockSpec((1, width), lambda i: (0, 0)),
                pl.BlockSpec((width, k), lambda i: (0, 0)),
                pl.BlockSpec((k, width), lambda i: (0, 0)),
            ],
            out_specs=pl.BlockSpec((tile_rows, width), lambda i: (i, 0)),
        ),
        compiler_params=_compiler_params(vmem_capacity),
        cost_estimate=_cost_estimate(rows, features, x.dtype),
    )(x2, gamma_w, beta_w, seg_sum, seg_bcast)
    return out.reshape(orig_shape)


def layer_norm(x, gamma, beta, eps=1e-6, *, tile_rows=None):
    """LayerNorm over the last axis of x. gamma/beta have shape (features,)."""
    orig_shape = x.shape
    features = int(orig_shape[-1])
    rows = int(math.prod(orig_shape[:-1])) if len(orig_shape) > 1 else 1
    vmem_capacity = _vmem_capacity_bytes()

    # Lane-dense packing for narrow feature dims: fold k rows into the lane axis
    # so every block's last dim is a full 128-lane vreg (unmasked stores).
    if features < 128 and 128 % features == 0:
        k = 128 // features
        if k > 1 and rows % k == 0 and rows >= k:
            try:
                return _layer_norm_packed(x, gamma, beta, eps, k, rows, features,
                                          vmem_capacity, tile_rows)
            except Exception:
                # Defensive: fall back to the general layout if the MXU
                # segmented-reduce variant fails to lower on this jax/Mosaic.
                pass
    return _layer_norm_general(x, gamma, beta, eps, rows, features,
                               vmem_capacity, tile_rows)


def _reference(x, gamma, beta, eps=1e-6):
    x32 = x.astype(jnp.float32)
    mean = jnp.mean(x32, axis=-1, keepdims=True)
    var = jnp.var(x32, axis=-1, keepdims=True, ddof=1)   # unbiased, like torch.std
    std = jnp.sqrt(var)
    return (gamma * (x32 - mean) / (std + eps) + beta).astype(x.dtype)


if __name__ == "__main__":
    key = jax.random.PRNGKey(0)
    batch, seq, hidden = 2, 8, 32

    x = jax.random.normal(key, (batch, seq, hidden), dtype=jnp.float32)
    # deterministic params matching nn.Parameter(torch.ones/zeros(features))
    gamma = jnp.ones((hidden,), dtype=jnp.float32)
    beta = jnp.zeros((hidden,), dtype=jnp.float32)

    out = jax.block_until_ready(layer_norm(x, gamma, beta, eps=1e-6))
    ref = _reference(x, gamma, beta, eps=1e-6)
    assert out.shape == x.shape
    assert jnp.allclose(out, ref, atol=1e-4, rtol=1e-4), "mismatch (packed lane-dense path)"

    # Non-trivial gamma/beta plus rows that neither pack nor tile evenly.
    k1, k2, k3 = jax.random.split(jax.random.PRNGKey(1), 3)
    gamma_r = 1.0 + 0.1 * jax.random.normal(k2, (hidden,), dtype=jnp.float32)
    beta_r = 0.1 * jax.random.normal(k3, (hidden,), dtype=jnp.float32)

    x_odd = jax.random.normal(k1, (3, 5, hidden), dtype=jnp.float32)   # general path, partial block
    out_odd = jax.block_until_ready(layer_norm(x_odd, gamma_r, beta_r, eps=1e-6))
    assert jnp.allclose(out_odd, _reference(x_odd, gamma_r, beta_r, eps=1e-6),
                        atol=1e-4, rtol=1e-4), "mismatch (general path, partial block)"

    x_pk = jax.random.normal(k1, (4, 16, hidden), dtype=jnp.float32)   # packed path, 2 grid blocks
    out_pk = jax.block_until_ready(layer_norm(x_pk, gamma_r, beta_r, eps=1e-6))
    assert jnp.allclose(out_pk, _reference(x_pk, gamma_r, beta_r, eps=1e-6),
                        atol=1e-4, rtol=1e-4), "mismatch (packed, multi-block)"

    x_wide = jax.random.normal(k1, (2, 8, 256), dtype=jnp.float32)     # general path, wide features
    gw = 1.0 + 0.1 * jax.random.normal(k2, (256,), dtype=jnp.float32)
    bw = 0.1 * jax.random.normal(k3, (256,), dtype=jnp.float32)
    out_w = jax.block_until_ready(layer_norm(x_wide, gw, bw, eps=1e-6))
    assert jnp.allclose(out_w, _reference(x_wide, gw, bw, eps=1e-6),
                        atol=1e-4, rtol=1e-4), "mismatch (wide features)"

    print("KERNEL_OK")
</pallas_src>

<mosaic_0001>
module attributes {stable_mosaic.version = 11 : i64} {
  func.func @_layernorm_packed_kernel(%arg0: i32, %arg1: memref<4x128xf32, #tpu.memory_space<vmem>>, %arg2: memref<1x128xf32, #tpu.memory_space<vmem>>, %arg3: memref<1x128xf32, #tpu.memory_space<vmem>>, %arg4: memref<128x4xf32, #tpu.memory_space<vmem>>, %arg5: memref<4x128xf32, #tpu.memory_space<vmem>>, %arg6: memref<4x128xf32, #tpu.memory_space<vmem>>) attributes {dimension_semantics = [#tpu.dimension_semantics<parallel>], iteration_bounds = array<i64: 1>, scalar_prefetch = 0 : i64, scratch_operands = 0 : i64, tpu.core_type = #tpu.core_type<tc>, window_params = [{transform_indices = @transform_0, window_bounds = array<i64: 4, 128>}, {pipeline_mode = #tpu.pipeline_mode<synchronous>, transform_indices = @transform_1, window_bounds = array<i64: 1, 128>}, {pipeline_mode = #tpu.pipeline_mode<synchronous>, transform_indices = @transform_2, window_bounds = array<i64: 1, 128>}, {pipeline_mode = #tpu.pipeline_mode<synchronous>, transform_indices = @transform_3, window_bounds = array<i64: 128, 4>}, {pipeline_mode = #tpu.pipeline_mode<synchronous>, transform_indices = @transform_4, window_bounds = array<i64: 4, 128>}, {transform_indices = @transform_5, window_bounds = array<i64: 4, 128>}]} {
    %c0 = arith.constant 0 : index
    %c0_0 = arith.constant 0 : index
    %0 = vector.load %arg1[%c0, %c0_0] : memref<4x128xf32, #tpu.memory_space<vmem>>, vector<4x128xf32>
    %c0_1 = arith.constant 0 : index
    %c0_2 = arith.constant 0 : index
    %1 = vector.load %arg4[%c0_1, %c0_2] : memref<128x4xf32, #tpu.memory_space<vmem>>, vector<128x4xf32>
    %cst = arith.constant dense<0.000000e+00> : vector<4x4xf32>
    %2 = tpu.matmul %0, %1, %cst {dimension_numbers = #tpu.dot_dimension_numbers<[1], [0], [0], [1], [0, 0, 1, 1], [], []>} : vector<4x128xf32>, vector<128x4xf32>, vector<4x4xf32> -> vector<4x4xf32>
    %3 = arith.mulf %0, %0 : vector<4x128xf32>
    %cst_3 = arith.constant dense<0.000000e+00> : vector<4x4xf32>
    %4 = tpu.matmul %3, %1, %cst_3 {dimension_numbers = #tpu.dot_dimension_numbers<[1], [0], [0], [1], [0, 0, 1, 1], [], []>} : vector<4x128xf32>, vector<128x4xf32>, vector<4x4xf32> -> vector<4x4xf32>
    %cst_4 = arith.constant 3.125000e-02 : f32
    %5 = vector.broadcast %cst_4 : f32 to vector<4x4xf32>
    %6 = arith.mulf %2, %5 : vector<4x4xf32>
    %cst_5 = arith.constant 3.200000e+01 : f32
    %7 = vector.broadcast %cst_5 : f32 to vector<4x4xf32>
    %8 = arith.mulf %7, %6 : vector<4x4xf32>
    %9 = arith.mulf %8, %6 : vector<4x4xf32>
    %10 = arith.subf %4, %9 : vector<4x4xf32>
    %cst_6 = arith.constant 0.0322580636 : f32
    %11 = vector.broadcast %cst_6 : f32 to vector<4x4xf32>
    %12 = arith.mulf %10, %11 : vector<4x4xf32>
    %cst_7 = arith.constant 0.000000e+00 : f32
    %13 = vector.broadcast %cst_7 : f32 to vector<4x4xf32>
    %14 = arith.maximumf %12, %13 : vector<4x4xf32>
    %15 = math.sqrt %14 : vector<4x4xf32>
    %cst_8 = arith.constant 9.99999997E-7 : f32
    %16 = vector.broadcast %cst_8 : f32 to vector<4x4xf32>
    %17 = arith.addf %15, %16 : vector<4x4xf32>
    %18 = tpu.reciprocal %17 {approx = true} : vector<4x4xf32> -> vector<4x4xf32>
    %19 = arith.mulf %17, %18 : vector<4x4xf32>
    %cst_9 = arith.constant 2.000000e+00 : f32
    %20 = vector.broadcast %cst_9 : f32 to vector<4x4xf32>
    %21 = arith.subf %20, %19 : vector<4x4xf32>
    %22 = arith.mulf %18, %21 : vector<4x4xf32>
    %c0_10 = arith.constant 0 : index
    %c0_11 = arith.constant 0 : index
    %23 = vector.load %arg5[%c0_10, %c0_11] : memref<4x128xf32, #tpu.memory_space<vmem>>, vector<4x128xf32>
    %cst_12 = arith.constant dense<0.000000e+00> : vector<4x128xf32>
    %24 = tpu.matmul %6, %23, %cst_12 {dimension_numbers = #tpu.dot_dimension_numbers<[1], [0], [0], [1], [0, 0, 1, 1], [], []>} : vector<4x4xf32>, vector<4x128xf32>, vector<4x128xf32> -> vector<4x128xf32>
    %cst_13 = arith.constant dense<0.000000e+00> : vector<4x128xf32>
    %25 = tpu.matmul %22, %23, %cst_13 {dimension_numbers = #tpu.dot_dimension_numbers<[1], [0], [0], [1], [0, 0, 1, 1], [], []>} : vector<4x4xf32>, vector<4x128xf32>, vector<4x128xf32> -> vector<4x128xf32>
    %c0_14 = arith.constant 0 : index
    %c0_15 = arith.constant 0 : index
    %26 = vector.load %arg2[%c0_14, %c0_15] : memref<1x128xf32, #tpu.memory_space<vmem>>, vector<1x128xf32>
    %27 = arith.subf %0, %24 : vector<4x128xf32>
    %28 = arith.mulf %27, %25 : vector<4x128xf32>
    %29 = vector.broadcast %26 : vector<1x128xf32> to vector<4x128xf32>
    %30 = arith.mulf %29, %28 : vector<4x128xf32>
    %c0_16 = arith.constant 0 : index
    %c0_17 = arith.constant 0 : index
    %31 = vector.load %arg3[%c0_16, %c0_17] : memref<1x128xf32, #tpu.memory_space<vmem>>, vector<1x128xf32>
    %32 = vector.broadcast %31 : vector<1x128xf32> to vector<4x128xf32>
    %33 = arith.addf %30, %32 : vector<4x128xf32>
    %c0_18 = arith.constant 0 : index
    %c0_19 = arith.constant 0 : index
    %34 = vector.load %arg6[%c0_18, %c0_19] : memref<4x128xf32, #tpu.memory_space<vmem>>, vector<4x128xf32>
    tpu.vector_store %arg6[%c0_18, %c0_19], %33 {strides = array<i32>} : memref<4x128xf32, #tpu.memory_space<vmem>>, vector<4x128xf32>,
    return
  }
  func.func @transform_0(%arg0: i32) -> (i32, i32) {
    %c0_i32 = arith.constant 0 : i32
    %c0_i32_0 = arith.constant 0 : i32
    return %arg0, %c0_i32 : i32, i32
  }
  func.func @transform_1(%arg0: i32) -> (i32, i32) {
    %c0_i32 = arith.constant 0 : i32
    %c0_i32_0 = arith.constant 0 : i32
    %c0_i32_1 = arith.constant 0 : i32
    return %c0_i32, %c0_i32_0 : i32, i32
  }
  func.func @transform_2(%arg0: i32) -> (i32, i32) {
    %c0_i32 = arith.constant 0 : i32
    %c0_i32_0 = arith.constant 0 : i32
    %c0_i32_1 = arith.constant 0 : i32
    return %c0_i32, %c0_i32_0 : i32, i32
  }
  func.func @transform_3(%arg0: i32) -> (i32, i32) {
    %c0_i32 = arith.constant 0 : i32
    %c0_i32_0 = arith.constant 0 : i32
    %c0_i32_1 = arith.constant 0 : i32
    return %c0_i32, %c0_i32_0 : i32, i32
  }
  func.func @transform_4(%arg0: i32) -> (i32, i32) {
    %c0_i32 = arith.constant 0 : i32
    %c0_i32_0 = arith.constant 0 : i32
    %c0_i32_1 = arith.constant 0 : i32
    return %c0_i32, %c0_i32_0 : i32, i32
  }
  func.func @transform_5(%arg0: i32) -> (i32, i32) {
    %c0_i32 = arith.constant 0 : i32
    %c0_i32_0 = arith.constant 0 : i32
    return %arg0, %c0_i32 : i32, i32
  }
}

module attributes {stable_mosaic.version = 11 : i64} {
  func.func @_layernorm_kernel(%arg0: i32, %arg1: memref<8x32xf32, #tpu.memory_space<vmem>>, %arg2: memref<1x32xf32, #tpu.memory_space<vmem>>, %arg3: memref<1x32xf32, #tpu.memory_space<vmem>>, %arg4: memref<8x32xf32, #tpu.memory_space<vmem>>) attributes {dimension_semantics = [#tpu.dimension_semantics<parallel>], iteration_bounds = array<i64: 2>, scalar_prefetch = 0 : i64, scratch_operands = 0 : i64, tpu.core_type = #tpu.core_type<tc>, window_params = [{transform_indices = @transform_0, window_bounds = array<i64: 8, 32>}, {pipeline_mode = #tpu.pipeline_mode<synchronous>, transform_indices = @transform_1, window_bounds = array<i64: 1, 32>}, {pipeline_mode = #tpu.pipeline_mode<synchronous>, transform_indices = @transform_2, window_bounds = array<i64: 1, 32>}, {transform_indices = @transform_3, window_bounds = array<i64: 8, 32>}]} {
    %c0 = arith.constant 0 : index
    %c0_0 = arith.constant 0 : index
    %0 = vector.load %arg1[%c0, %c0_0] : memref<8x32xf32, #tpu.memory_space<vmem>>, vector<8x32xf32>
    %cst = arith.constant dense<0.000000e+00> : vector<8xf32>
    %1 = vector.multi_reduction <add>, %0, %cst [1] : vector<8x32xf32> to vector<8xf32>
    %2 = vector.shape_cast %1 : vector<8xf32> to vector<8x1xf32>
    %3 = arith.mulf %0, %0 : vector<8x32xf32>
    %cst_1 = arith.constant dense<0.000000e+00> : vector<8xf32>
    %4 = vector.multi_reduction <add>, %3, %cst_1 [1] : vector<8x32xf32> to vector<8xf32>
    %5 = vector.shape_cast %4 : vector<8xf32> to vector<8x1xf32>
    %cst_2 = arith.constant 3.125000e-02 : f32
    %6 = vector.broadcast %cst_2 : f32 to vector<8x1xf32>
    %7 = arith.mulf %2, %6 : vector<8x1xf32>
    %cst_3 = arith.constant 3.200000e+01 : f32
    %8 = vector.broadcast %cst_3 : f32 to vector<8x1xf32>
    %9 = arith.mulf %8, %7 : vector<8x1xf32>
    %10 = arith.mulf %9, %7 : vector<8x1xf32>
    %11 = arith.subf %5, %10 : vector<8x1xf32>
    %cst_4 = arith.constant 0.0322580636 : f32
    %12 = vector.broadcast %cst_4 : f32 to vector<8x1xf32>
    %13 = arith.mulf %11, %12 : vector<8x1xf32>
    %cst_5 = arith.constant 0.000000e+00 : f32
    %14 = vector.broadcast %cst_5 : f32 to vector<8x1xf32>
    %15 = arith.maximumf %13, %14 : vector<8x1xf32>
    %16 = math.sqrt %15 : vector<8x1xf32>
    %cst_6 = arith.constant 9.99999997E-7 : f32
    %17 = vector.broadcast %cst_6 : f32 to vector<8x1xf32>
    %18 = arith.addf %16, %17 : vector<8x1xf32>
    %19 = tpu.reciprocal %18 {approx = true} : vector<8x1xf32> -> vector<8x1xf32>
    %20 = arith.mulf %18, %19 : vector<8x1xf32>
    %cst_7 = arith.constant 2.000000e+00 : f32
    %21 = vector.broadcast %cst_7 : f32 to vector<8x1xf32>
    %22 = arith.subf %21, %20 : vector<8x1xf32>
    %23 = arith.mulf %19, %22 : vector<8x1xf32>
    %c0_8 = arith.constant 0 : index
    %c0_9 = arith.constant 0 : index
    %24 = vector.load %arg2[%c0_8, %c0_9] : memref<1x32xf32, #tpu.memory_space<vmem>>, vector<1x32xf32>
    %25 = vector.broadcast %7 : vector<8x1xf32> to vector<8x32xf32>
    %26 = arith.subf %0, %25 : vector<8x32xf32>
    %27 = vector.broadcast %23 : vector<8x1xf32> to vector<8x32xf32>
    %28 = arith.mulf %26, %27 : vector<8x32xf32>
    %29 = vector.broadcast %24 : vector<1x32xf32> to vector<8x32xf32>
    %30 = arith.mulf %29, %28 : vector<8x32xf32>
    %c0_10 = arith.constant 0 : index
    %c0_11 = arith.constant 0 : index
    %31 = vector.load %arg3[%c0_10, %c0_11] : memref<1x32xf32, #tpu.memory_space<vmem>>, vector<1x32xf32>
    %32 = vector.broadcast %31 : vector<1x32xf32> to vector<8x32xf32>
    %33 = arith.addf %30, %32 : vector<8x32xf32>
    %c0_12 = arith.constant 0 : index
    %c0_13 = arith.constant 0 : index
    %34 = vector.load %arg4[%c0_12, %c0_13] : memref<8x32xf32, #tpu.memory_space<vmem>>, vector<8x32xf32>
    tpu.vector_store %arg4[%c0_12, %c0_13], %33 {strides = array<i32>} : memref<8x32xf32, #tpu.memory_space<vmem>>, vector<8x32xf32>,
    return
  }
  func.func @transform_0(%arg0: i32) -> (i32, i32) {
    %c0_i32 = arith.constant 0 : i32
    %c0_i32_0 = arith.constant 0 : i32
    return %arg0, %c0_i32 : i32, i32
  }
  func.func @transform_1(%arg0: i32) -> (i32, i32) {
    %c0_i32 = arith.constant 0 : i32
    %c0_i32_0 = arith.constant 0 : i32
    %c0_i32_1 = arith.constant 0 : i32
    return %c0_i32, %c0_i32_0 : i32, i32
  }
  func.func @transform_2(%arg0: i32) -> (i32, i32) {
    %c0_i32 = arith.constant 0 : i32
    %c0_i32_0 = arith.constant 0 : i32
    %c0_i32_1 = arith.constant 0 : i32
    return %c0_i32, %c0_i32_0 : i32, i32
  }
  func.func @transform_3(%arg0: i32) -> (i32, i32) {
    %c0_i32 = arith.constant 0 : i32
    %c0_i32_0 = arith.constant 0 : i32
    return %arg0, %c0_i32 : i32, i32
  }
}

</mosaic_0001>

<bundles_post_ra>
// kernel: tpu_custom_call.1
= control target key start
LH: loop header
LB: loop body
LE: loop exit
PB: predicated region body
PF: predicated region fallthrough
CT: control target
= control target key end

     0   :  { %s316_s0 = inlined_call_operand.vmem [shape: f32[4,128], index: 0, kind: input, shape index: {}]   ;;  %s317_s1 = inlined_call_operand.vmem [shape: f32[1,128], index: 1, kind: input, shape index: {}]   ;;  %s318_s2 = inlined_call_operand.vmem [shape: f32[1,128], index: 2, kind: input, shape index: {}]   ;;  %s319_s3 = inlined_call_operand.vmem [shape: f32[128,4], index: 3, kind: input, shape index: {}]   ;;  %s320_s4 = inlined_call_operand.vmem [shape: f32[4,128], index: 4, kind: input, shape index: {}]   ;;  %s321_s5 = inlined_call_operand.hbm [shape: f32[4,128], index: 5, kind: output, shape index: {}]  }
   0x1   :  { %v37_v0 = vld [vmem:[%s319_s3 + $0x78] sm:$0xff]  ;;  %v36_v1 = vld [vmem:[%s319_s3 + $0x70] sm:$0xff]  ;;  %v35_v2 = vld [vmem:[%s319_s3 + $0x68] sm:$0xff] }
   0x2   :  { %38 = vmatpush.msra.mxu0 %v37_v0  ;;  %59 = vmatpush.msra.mxu1 %v37_v0  ;;  %v34_v3 = vld [vmem:[%s319_s3 + $0x60] sm:$0xff]  ;;  %v33_v4 = vld [vmem:[%s319_s3 + $0x58] sm:$0xff] }
   0x4   :  { %39 = vmatpush.msra.mxu0 %v36_v1  ;;  %60 = vmatpush.msra.mxu1 %v36_v1 }
   0x6   :  { %40 = vmatpush.msra.mxu0 %v35_v2  ;;  %61 = vmatpush.msra.mxu1 %v35_v2 }
   0x7   :  { %10 = vsyncpa [#allocation3], 0  ;;  %v32_v5 = vld [vmem:[%s319_s3 + $0x50] sm:$0xff]  ;;  %v31_v6 = vld [vmem:[%s319_s3 + $0x48] sm:$0xff]  ;;  %vm107_vm0 = vcmask 1043456   ;;  %vm103_vm1 = vcmask 31744  }
   0x8   :  { %41 = vmatpush.msra.mxu0 %v34_v3  ;;  %62 = vmatpush.msra.mxu1 %v34_v3  ;;  %v30_v7 = vld [vmem:[%s319_s3 + $0x40] sm:$0xff]  ;;  %v29_v8 = vld [vmem:[%s319_s3 + $0x38] sm:$0xff]  ;;  %v28_v9 = vld [vmem:[%s319_s3 + $0x30] sm:$0xff]  ;;  %s220_s30 = smov [#allocation2]   ;;  %s174_s9 = sshll.u32 %s321_s5, 4  ;;  %s175_s9 = int_to_ptr.hbm [resolvable:$true] %s174_s9 }
   0x9   :  { %v27_v10 = vld [vmem:[%s319_s3 + $0x28] sm:$0xff]  ;;  %v26_v11 = vld [vmem:[%s319_s3 + $0x20] sm:$0xff]  ;;  %v25_v12 = vld [vmem:[%s319_s3 + $0x18] sm:$0xff]  ;;  %s172_s6 = sshll.u32 %s220_s30, 4  ;;  %s173_s6 = int_to_ptr.vmem [resolvable:$true] %s172_s6 }
   0xa   :  { %42 = vmatpush.msra.mxu0 %v33_v4  ;;  %63 = vmatpush.msra.mxu1 %v33_v4  ;;  %v24_v13 = vld [vmem:[%s319_s3 + $0x10] sm:$0xff]  ;;  %v23_v14 = vld [vmem:[%s319_s3 + $0x8] sm:$0xff]  ;;  %v21_v15 = vld [vmem:[%s316_s0] sm:$0xf] }
   0xb   :  { %v22_v16 = vld [vmem:[%s319_s3] sm:$0xff]  ;;  %v58_v17 = vmul.f32 %v21_v15, %v21_v15 }
   0xc   :  { %43 = vmatpush.msra.mxu0 %v32_v5  ;;  %64 = vmatpush.msra.mxu1 %v32_v5  ;;  %v102_v18 = vld [vmem:[%s320_s4] sm:$0xf] }
   0xd   :  { %183 = vmatpush.msk.msra.mxu2 %vm107_vm0, %v102_v18  ;;  %185 = vmatpush.msk.msra.mxu3 %vm107_vm0, %v102_v18  ;;  %v188_v44 = vld [vmem:[%s317_s1] ss:$0 sm:$0xff] }
   0xe   :  { %44 = vmatpush.msra.mxu0 %v31_v6  ;;  %65 = vmatpush.msra.mxu1 %v31_v6  ;;  %v189_v47 = vld [vmem:[%s318_s2] ss:$0 sm:$0xff] }
  0x10   :  { %45 = vmatpush.msra.mxu0 %v30_v7  ;;  %66 = vmatpush.msra.mxu1 %v30_v7 }
  0x12   :  { %46 = vmatpush.msra.mxu0 %v29_v8  ;;  %67 = vmatpush.msra.mxu1 %v29_v8 }
  0x14   :  { %47 = vmatpush.msra.mxu0 %v28_v9  ;;  %68 = vmatpush.msra.mxu1 %v28_v9 }
  0x16   :  { %48 = vmatpush.msra.mxu0 %v27_v10  ;;  %69 = vmatpush.msra.mxu1 %v27_v10 }
  0x18   :  { %49 = vmatpush.msra.mxu0 %v26_v11  ;;  %70 = vmatpush.msra.mxu1 %v26_v11 }
  0x1a   :  { %50 = vmatpush.msra.mxu0 %v25_v12  ;;  %71 = vmatpush.msra.mxu1 %v25_v12 }
  0x1c   :  { %51 = vmatpush.msra.mxu0 %v24_v13  ;;  %72 = vmatpush.msra.mxu1 %v24_v13 }
  0x1e   :  { %52 = vmatpush.msra.mxu0 %v23_v14  ;;  %73 = vmatpush.msra.mxu1 %v23_v14 }
  0x20   :  { %53 = vmatpush.msra.mxu0 %v22_v16  ;;  %74 = vmatpush.msra.mxu1 %v22_v16 }
  0x21   :  { %54 = vmatmul.f32.vlgmr.msra.gmra.mxu0 %v21_v15  ;;  %75 = vmatmul.f32.vlgmr.msra.gmra.mxu1 %v58_v17 }
  0x9e   :  { %v55_v19 = vpop.f32.mrf.mxu0  ;;  %v76_v22 = vpop.f32.mrf.mxu1 }
  0x9f   :  { %v79_v20 = vmul.f32 0.03125, %v55_v19 }
  0xa1   :  { %v80_v21 = vmul.f32 32.0, %v79_v20  ;;  %184 = vmatmul.msk.f32.vlgmr.msra.gmra.mxu2 %vm103_vm1, %v79_v20 }
  0xa3   :  { %v81_v23 = vmul.f32 %v80_v21, %v79_v20 }
  0xa5   :  { %v82_v24 = vsub.f32 %v76_v22, %v81_v23 }
  0xa7   :  { %v83_v25 = vmul.f32 0.032258064, %v82_v24 }
  0xa9   :  { %v84_v26 = vmax.f32 %v83_v25, 0.0 }
  0xab   :  { %190 = vrsqrt.f32 %v84_v26  ;;  %vm92_vm2 = vcmp.eq.f32.partialorder %v84_v26, inf  ;;  %v95_v34 = vand.u32 2147483648, %v84_v26  ;;  %vm94_vm3 = vcmp.eq.f32.partialorder %v84_v26, 0.0 }
  0xb1   :  { %v191_v27 = vpop.eup %190 }
  0xb2   :  { %v86_v28 = vmul.f32 %v191_v27, %v84_v26 }
  0xb4   :  { %v87_v29 = vmul.f32 %v191_v27, %v86_v28 }
  0xb6   :  { %v88_v30 = vmul.f32 0.5, %v87_v29 }
  0xb8   :  { %v89_v31 = vsub.f32 1.5, %v88_v30 }
  0xba   :  { %v90_v32 = vmul.f32 %v191_v27, %v89_v31 }
  0xbc   :  { %v91_v33 = vmul.f32 %v90_v32, %v84_v26 }
  0xbe   :  { %v93_v35 = vsel %vm92_vm2, %v84_v26, %v91_v33 }
  0xbf   :  { %v96_v36 = vsel %vm94_vm3, %v95_v34, %v93_v35 }
  0xc0   :  { %v97_v37 = vadd.f32 1e-06, %v96_v36 }
  0xc2   :  { %192 = vrcp.f32 %v97_v37 }
  0xc8   :  { %v193_v38 = vpop.eup %192 }
  0xc9   :  { %v99_v39 = vmul.f32 %v193_v38, %v97_v37 }
  0xcb   :  { %v100_v40 = vsub.f32 2.0, %v99_v39 }
  0xcd   :  { %v101_v41 = vmul.f32 %v193_v38, %v100_v40 }
  0xcf   :  { %186 = vmatmul.msk.f32.vlgmr.msra.gmra.mxu3 %vm103_vm1, %v101_v41 }
 0x124   :  { %v128_v42 = vpop.f32.mrf.mxu2 }
 0x125   :  { %v155_v43 = vsub.f32 %v21_v15, %v128_v42 }
 0x152   :  { %v151_v45 = vpop.f32.mrf.mxu3 }
 0x153   :  { %v156_v46 = vmul.f32 %v155_v43, %v151_v45 }
 0x155   :  { %v160_v48 = vmul.f32 %v188_v44, %v156_v46 }
 0x157   :  { %v165_v49 = vadd.f32 %v189_v47, %v160_v48 }
 0x159   :  { %166 = vst [vmem:[#allocation2] sm:$0xf] %v165_v49 }
 0x15a   :  { %177 = dma.vmem_to_hbm [thread:$0]  %s173_s6, 64, %s175_s9, [#allocation3]  }
 0x15b   :  { %218 = dma.done.wait [#allocation3], 64  }
 0x15c   :  { %219 = vsyncadd [#allocation3], 4294967232 }
 0x15d   :  { %182 = vsyncpa [#allocation3], 1 }

// kernel: tpu_custom_call.1
= control target key start
LH: loop header
LB: loop body
LE: loop exit
PB: predicated region body
PF: predicated region fallthrough
CT: control target
= control target key end

     0   :  { %8 = vsyncpa [#allocation3], 0  ;;  %s722_s0 = inlined_call_operand.hbm [shape: f32[16,32], index: 0, kind: input, shape index: {}]   ;;  %s723_s1 = inlined_call_operand.hbm [shape: f32[1,32], index: 1, kind: input, shape index: {}]   ;;  %s724_s2 = inlined_call_operand.vmem [shape: f32[1,32], index: 2, kind: input, shape index: {}]   ;;  %s725_s3 = inlined_call_operand.hbm [shape: f32[16,32], index: 3, kind: output, shape index: {}]  }
   0x1   :  { %10 = vsyncpa [#allocation3 + $0x1], 0 }
   0x2   :  { %11 = vsyncpa [#allocation6], 0 }
   0x3   :  { %12 = vsyncpa [#allocation4], 0 }
   0x4   :  { %14 = vsyncpa [#allocation4 + $0x1], 0  ;;  %s574_s12 = smov 0   ;;  %s576_s13 = smov 0  }
   0x5   :  { %s578_s14 = smov 0   ;;  %s580_s15 = smov 0  }
   0x6 LB: > { %s595_s16 = sadd.s32 4294967295, %s551_s15   ;;  %s344_s17 = sadd.s32 4294967294, %s551_s15   ;;  %s551_s15 = sphi %s580_s15, %s735_s15   ;;  %s547_s14 = sphi %s578_s14, %s734_s14   ;;  %s543_s13 = sphi %s576_s13, %s733_s13   ;;  %s539_s12 = sphi %s574_s12, %s732_s12  }
   0x7   : > { %p40_p0 = scmp.ne.s32.totalorder %s543_s13, %s539_s12  ;;  %p41_p1 = scmp.eq.s32.totalorder %s595_s16, 0 }
   0x8   : > { %p106_p2 = scmp.eq.s32.totalorder %s595_s16, 1  ;;  %p112_p3 = scmp.eq.s32.totalorder %s344_s17, 1 }
   0x9   : > { %p604_p4 = por %p41_p1, %p40_p0  ;;  %p345_p5 = scmp.ge.s32.totalorder %s551_s15, 1 }
   0xa   : > { %p609_p6 = por %p112_p3, %p40_p0  ;;  %p119_p7 = scmp.lt.s32.totalorder %s551_s15, 3 }
   0xb   : > { %s131_s22 = sshll.u32 %s723_s1, 4  ;;  %s553_s24 = smov [#allocation5]   ;;  %s132_s22 = int_to_ptr.hbm [resolvable:$true] %s131_s22 }
   0xc   : > { %p617_p8 = pnand %p345_p5, %p119_p7  ;;  %s133_s25 = sshll.u32 %s553_s24, 4  ;;  %s134_s25 = int_to_ptr.vmem [resolvable:$true] %s133_s25 }
   0xd   : > { %s627_s26 = sadd.s32 1, %s551_s15   ;;  %s27_s27 = sadd.s32 1, %s547_s14 }
   0xe   : > { %p366_p10 = pneg %p617_p8  ;;  %s24_s28 = ssub.s32 %s551_s15, %s627_s26 }
   0xf   : > { %p25_p12 = scmp.eq.s32.totalorder %s24_s28, 0  ;;  %p34_p13 = scmp.ne.s32.totalorder %s547_s14, %s543_s13 }
  0x10   : > { %p367_p11 = pnand %p366_p10, %p41_p1  ;;  %p35_p0 = scmp.eq.s32.totalorder %s551_s15, 0 }
  0x11   : > { %s636_s29 = scalar_select %p25_p12, %s547_s14, %s27_s27  }
  0x12   : > { %369 = dma.hbm_to_vmem [thread:$0]  (!%p367_p11), %s132_s22, 16, %s134_s25, [#allocation6]  }
  0x13   : > { %p640_p3 = por %p106_p2, %p34_p13  ;;  %p379_p5 = scmp.lt.s32.totalorder %s551_s15, 2 }
  0x14   : > { %s147_s4 = sand.u32 1, %s547_s14   ;;  %s349_s5 = sshll.u32 %s551_s15, 3 }
  0x15   : > { %p36_p7 = por %p35_p0, %p34_p13  ;;  %s348_s6 = sshll.u32 %s147_s4, 3 }
  0x16   : > { %s155_s9 = scalar_lea.hbm %s722_s0, %s349_s5  ;;  %s151_s11 = scalar_lea.vmem [#allocation2], %s348_s6 }
  0x17   : > { %s157_s10 = sshll.u32 %s155_s9, 4  ;;  %s159_s17 = sshll.u32 %s151_s11, 4  ;;  %s158_s10 = int_to_ptr.hbm [resolvable:$true] %s157_s10  ;;  %s160_s17 = int_to_ptr.vmem [resolvable:$true] %s159_s17 }
  0x18   : > { %p650_p10 = pnand %p379_p5, %p36_p7  ;;  %s148_s21 = scalar_lea.sflag [#allocation3], %s147_s4 }
  0x19   : > { %s451_s22 = sshra.s32 %s158_s10, 4  ;;  %s458_s28 = scalar_lea.hbm %s722_s0, 16  ;;  %s452_s22 = int_to_ptr.hbm [resolvable:$true] %s451_s22 }
  0x1a   : > { %s453_s24 = scalar_lea.hbm %s452_s22, 8  ;;  %p455_p11 = pneg %p650_p10 }
  0x1b   : > { %p454_p2 = scmp.ne.s32.totalorder %s452_s22, %s453_s24  ;;  %p459_p0 = scmp.lt.s32.totalorder %s452_s22, %s722_s0 }
  0x1c   : > { %p460_p5 = scmp.lt.s32.totalorder %s458_s28, %s453_s24 }
  0x1d   : > { %p456_p12 = pnand %p455_p11, %p454_p2 }
  0x1e   : > { %p461_p7 = por %p460_p5, %p459_p0 }
  0x1f   : > { %p457_p13 = pneg %p456_p12 }
  0x21   : > { %p462_p9 = pnand %p461_p7, %p457_p13 }
  0x23   : > { %465 = shalt.err (!%p462_p9)
}
  0x24   : > { %373 = dma.hbm_to_vmem [thread:$0]  (!%p650_p10), %s158_s10, 128, %s160_s17, %s148_s21  }
  0x25   : > { %168 = sbr.rel (%p617_p8) target bundleno = 222 (0xde), region = 32  ;;  %s667_s4 = sand.u32 (!%p617_p8), 1, %s543_s13  }
  0x26   : > { %s351_s7 = sshll.u32 (!%p617_p8), %s667_s4, 3  ;;  %s171_s8 = scalar_lea.sflag (!%p617_p8), [#allocation3], %s667_s4 }
  0x27   : > { %s174_s9 = scalar_lea.vmem (!%p617_p8), [#allocation2], %s351_s7 }
  0x2a   : > { %526 = dma.done.wait (%p604_p4), %s171_s8, 128  }
  0x2b   : > { %528 = vsyncadd (%p604_p4), %s171_s8, 4294967168 }
  0x2c   : > { %530 = dma.done.wait (%p41_p1), [#allocation6], 16  }
  0x2d   : > { %532 = vsyncadd (%p41_p1), [#allocation6], 4294967280  ;;  %vm204_vm0 = vcmask 261120   ;;  %v203_v0 = vld [vmem:[%s174_s9] sm:$0xff]  ;;  %s355_s18 = sshll.u32 %s595_s16, 3  ;;  %s202_s21 = scalar_lea.vmem [#allocation7], %s351_s7 }
  0x2e   : > { %v205_v1 = vsel %vm204_vm0, %v203_v0, 0.0  ;;  %v208_v2 = vmul.f32 %v203_v0, %v203_v0  ;;  %v415_v28 = vld [vmem:[#allocation5] ss:$0 sm:$0xff]  ;;  %s259_s11 = scalar_lea.hbm %s725_s3, %s355_s18  ;;  %v416_v30 = vld [vmem:[%s724_s2] ss:$0 sm:$0xff]  ;;  %s261_s22 = sshll.u32 %s202_s21, 4  ;;  %s262_s22 = int_to_ptr.vmem [resolvable:$true] %s261_s22 }
  0x2f   : > { %206 = vadd.xlane.f32.xlu0 %v205_v1  ;;  %s263_s24 = sshll.u32 %s259_s11, 4  ;;  %s249_s16 = scalar_lea.sflag [#allocation4], %s667_s4  ;;  %s264_s24 = int_to_ptr.hbm [resolvable:$true] %s263_s24 }
  0x30   : > { %v209_v3 = vsel %vm204_vm0, %v208_v2, 0.0  ;;  %s495_s25 = sshra.s32 %s264_s24, 4  ;;  %s501_s6 = scalar_lea.hbm %s725_s3, 16  ;;  %s496_s25 = int_to_ptr.hbm [resolvable:$true] %s495_s25 }
  0x31   : > { %s497_s27 = scalar_lea.hbm %s496_s25, 8  ;;  %p502_p9 = scmp.lt.s32.totalorder %s496_s25, %s725_s3 }
  0x32   : > { %p498_p1 = scmp.ne.s32.totalorder %s496_s25, %s497_s27  ;;  %p503_p10 = scmp.lt.s32.totalorder %s501_s6, %s497_s27 }
  0x34   : > { %p499_p4 = pnand %p498_p1, %p640_p3  ;;  %p504_p2 = por %p503_p10, %p502_p9 }
  0x36   : > { %p500_p8 = pneg %p499_p4 }
  0x37   : > { %210 = vadd.xlane.f32.xlu0 %v209_v3 }
  0x38   : > { %p505_p11 = pnand %p504_p2, %p500_p8 }
  0xa2   : > { %v207_v4 = vpop.xlane.xlu0 %206 }
  0xa3   : > { %v212_v5 = vmul.f32 0.03125, %v207_v4 }
  0xa5   : > { %v213_v6 = vmul.f32 32.0, %v212_v5  ;;  %v236_v26 = vsub.f32 %v203_v0, %v212_v5 }
  0xa7   : > { %v214_v7 = vmul.f32 %v213_v6, %v212_v5 }
  0xaa   : > { %v211_v8 = vpop.xlane.xlu0 %210 }
  0xab   : > { %v215_v9 = vsub.f32 %v211_v8, %v214_v7 }
  0xad   : > { %v216_v10 = vmul.f32 0.032258064, %v215_v9 }
  0xaf   : > { %v217_v11 = vmax.f32 %v216_v10, 0.0 }
  0xb1   : > { %417 = vrsqrt.f32 %v217_v11  ;;  %vm225_vm1 = vcmp.eq.f32.partialorder %v217_v11, inf  ;;  %v228_v19 = vand.u32 2147483648, %v217_v11  ;;  %vm227_vm2 = vcmp.eq.f32.partialorder %v217_v11, 0.0 }
  0xb7   : > { %v418_v12 = vpop.eup %417 }
  0xb8   : > { %v219_v13 = vmul.f32 %v418_v12, %v217_v11 }
  0xba   : > { %v220_v14 = vmul.f32 %v418_v12, %v219_v13 }
  0xbc   : > { %v221_v15 = vmul.f32 0.5, %v220_v14 }
  0xbe   : > { %v222_v16 = vsub.f32 1.5, %v221_v15 }
  0xc0   : > { %v223_v17 = vmul.f32 %v418_v12, %v222_v16 }
  0xc2   : > { %v224_v18 = vmul.f32 %v223_v17, %v217_v11 }
  0xc4   : > { %v226_v20 = vsel %vm225_vm1, %v217_v11, %v224_v18 }
  0xc5   : > { %v229_v21 = vsel %vm227_vm2, %v228_v19, %v226_v20 }
  0xc6   : > { %v230_v22 = vadd.f32 1e-06, %v229_v21 }
  0xc8   : > { %419 = vrcp.f32 %v230_v22 }
  0xce   : > { %v420_v23 = vpop.eup %419 }
  0xcf   : > { %v232_v24 = vmul.f32 %v420_v23, %v230_v22 }
  0xd1   : > { %v233_v25 = vsub.f32 2.0, %v232_v24 }
  0xd3   : > { %v234_v27 = vmul.f32 %v420_v23, %v233_v25 }
  0xd5   : > { %v237_v29 = vmul.f32 %v236_v26, %v234_v27 }
  0xd7   : > { %v241_v31 = vmul.f32 %v415_v28, %v237_v29 }
  0xd9   : > { %v246_v32 = vadd.f32 %v416_v30, %v241_v31 }
  0xdb   : > { %247 = vst.msk [vmem:[%s202_s21] sm:$0xff] %vm204_vm0, %v246_v32 }
  0xdc   : > { %508 = shalt.err (!%p505_p11)
}
  0xdd   : > { %364 = dma.vmem_to_hbm [thread:$0]  (%p640_p3), %s262_s22, 128, %s264_s24, %s249_s16  }
  0xde PF: > { %s275_s4 = sand.u32 1, %s539_s12   ;;  %p731_p12 = scmp.ge.s32.totalorder %s551_s15, 2 }
  0xdf   : > { %s276_s9 = scalar_lea.sflag [#allocation4], %s275_s4 }
  0xe0   : > { %p375_p13 = pnand %p731_p12, %p609_p6 }
  0xe2   : > { %p376_p0 = pneg %p375_p13 }
  0xe4   : > { %534 = dma.done.wait (%p376_p0), %s276_s9, 128  }
  0xe5   : > { %536 = vsyncadd (%p376_p0), %s276_s9, 4294967168  ;;  %p17_p5 = scmp.ge.s32.totalorder %s627_s26, 4   ;;  %s732_s12 = smov %s543_s13 }
  0xe6   : > { %s733_s13 = smov %s547_s14  ;;  %s734_s14 = smov %s636_s29 }
  0xe7   : > { %s735_s15 = smov %s627_s26  ;;  %19 = sbr.rel (!%p17_p5) target bundleno = 6 (0x6), region = 81 }
  0xec   :  { %282 = vsyncpa [#allocation3], 1 }
  0xed   :  { %284 = vsyncpa [#allocation3 + $0x1], 1 }
  0xee   :  { %285 = vsyncpa [#allocation6], 1 }
  0xef   :  { %286 = vsyncpa [#allocation4], 1 }
  0xf0   :  { %288 = vsyncpa [#allocation4 + $0x1], 1 }

</bundles_post_ra>
